<compile_context>
chip_gen: v7x
topology: tpu7x:2x2x1
jax: 0.10.0
libtpu: 0.0.40
codegen_flags: <defaults>
</compile_context>

<pallas_src>
import functools

import jax
import jax.numpy as jnp
from jax.experimental import pallas as pl
from jax.experimental.pallas import tpu as pltpu


def _vmem_capacity_bytes() -> int:
    try:
        return int(pltpu.get_tpu_info().vmem_capacity_bytes)
    except Exception:
        return 64 << 20  # conservative default: v7x per-TensorCore VMEM


_VMEM_CAPACITY = _vmem_capacity_bytes()

# Probed lazily: whether this jax/Mosaic accepts pl.Buffered(1) on a BlockSpec.
_SINGLE_BUFFER_WEIGHTS_OK = None


# --------------------------------------------------------------------------
# Kernels
# --------------------------------------------------------------------------
def _mlp_resident_kernel(x_ref, w1_ref, b1_ref, w2_ref, b2_ref, o_ref):
    """Weights resident in VMEM; x/out streamed per batch tile."""
    # In-VMEM cast of the x tile to the MXU compute dtype (no-op for f32).
    x = x_ref[...].astype(w1_ref.dtype)
    # fc1: (tb, I) @ (I, H) -> f32 accumulate on the MXU.
    h = jnp.dot(x, w1_ref[...], preferred_element_type=jnp.float32)
    h = jnp.maximum(h + b1_ref[...], 0.0)                    # bias + ReLU (VPU, f32)
    # fc2: (tb, H) @ (H, O) -> f32 accumulate.
    y = jnp.dot(h.astype(w2_ref.dtype), w2_ref[...],
                preferred_element_type=jnp.float32)
    # NOTE: if O < 128 the store is a masked partial store (lane-sparse);
    # keep O (and H) lane-dense (multiples of 128) for production shapes.
    o_ref[...] = (y + b2_ref[...]).astype(o_ref.dtype)


def _mlp_htiled_kernel(x_ref, w1_ref, b1_ref, w2_ref, b2_ref, o_ref, acc_ref):
    """H-tiled fallback: streams (I, th) / (th, O) weight slabs, f32 accumulator.

    Valid because ReLU is elementwise over the hidden axis:
      y = sum_h relu(x @ W1[:, h] + b1[h]) @ W2[h, :] + b2
    """
    hi = pl.program_id(1)

    @pl.when(hi == 0)
    def _():
        acc_ref[...] = jnp.zeros_like(acc_ref)

    x = x_ref[...].astype(w1_ref.dtype)
    h = jnp.dot(x, w1_ref[...], preferred_element_type=jnp.float32)
    h = jnp.maximum(h + b1_ref[...], 0.0)
    acc_ref[...] += jnp.dot(h.astype(w2_ref.dtype), w2_ref[...],
                            preferred_element_type=jnp.float32)

    @pl.when(hi == pl.num_programs(1) - 1)
    def _():
        o_ref[...] = (acc_ref[...] + b2_ref[...]).astype(o_ref.dtype)


# --------------------------------------------------------------------------
# pallas_call wrapper (jitted; all tiling params static)
# --------------------------------------------------------------------------
@functools.partial(
    jax.jit,
    static_argnames=("tb", "th", "single_buffer_weights", "vmem_limit_bytes",
                     "tiled"))
def _mlp_pallas(x, w1, b1, w2, b2, *, tb, th, single_buffer_weights,
                vmem_limit_bytes, tiled):
    B, I = x.shape
    H = w1.shape[1]
    O = w2.shape[1]
    n_b = B // tb

    flops = 2 * B * H * (I + O)
    bytes_accessed = int(
        x.size * x.dtype.itemsize
        + w1.size * w1.dtype.itemsize + w2.size * w2.dtype.itemsize
        + b1.size * b1.dtype.itemsize + b2.size * b2.dtype.itemsize
        + B * O * x.dtype.itemsize)
    cost = pl.CostEstimate(flops=flops, transcendentals=0,
                           bytes_accessed=bytes_accessed)

    if not tiled:
        def wspec(shape):
            # Constant index_map -> weights stay VMEM-resident across grid
            # steps; single-buffer them (halves resident-weight VMEM) when
            # the installed Pallas supports pipeline_mode=pl.Buffered(1).
            imap = lambda i: (0, 0)
            if single_buffer_weights:
                return pl.BlockSpec(shape, imap, pipeline_mode=pl.Buffered(1))
            return pl.BlockSpec(shape, imap)

        return pl.pallas_call(
            _mlp_resident_kernel,
            out_shape=jax.ShapeDtypeStruct((B, O), x.dtype),
            grid=(n_b,),
            in_specs=[
                # x: streamed per batch tile (double-buffered by the pipeline).
                pl.BlockSpec((tb, I), lambda i: (i, 0)),
                wspec((I, H)),
                wspec((1, H)),
                wspec((H, O)),
                wspec((1, O)),
            ],
            out_specs=pl.BlockSpec((tb, O), lambda i: (i, 0)),
            compiler_params=pltpu.CompilerParams(
                dimension_semantics=("parallel",),
                vmem_limit_bytes=vmem_limit_bytes),
            cost_estimate=cost,
        )(x, w1, b1, w2, b2)

    # ---- H-tiled path: weights streamed, hidden axis is a reduction --------
    n_h = H // th
    return pl.pallas_call(
        _mlp_htiled_kernel,
        out_shape=jax.ShapeDtypeStruct((B, O), x.dtype),
        grid=(n_b, n_h),
        in_specs=[
            pl.BlockSpec((tb, I), lambda b, h: (b, 0)),   # resident across h
            pl.BlockSpec((I, th), lambda b, h: (0, h)),   # streamed W1 slab
            pl.BlockSpec((1, th), lambda b, h: (0, h)),   # streamed b1 slab
            pl.BlockSpec((th, O), lambda b, h: (h, 0)),   # streamed W2 slab
            pl.BlockSpec((1, O), lambda b, h: (0, 0)),    # b2 resident
        ],
        out_specs=pl.BlockSpec((tb, O), lambda b, h: (b, 0)),
        scratch_shapes=[pltpu.VMEM((tb, O), jnp.float32)],
        compiler_params=pltpu.CompilerParams(
            dimension_semantics=("parallel", "arbitrary"),
            vmem_limit_bytes=vmem_limit_bytes),
        cost_estimate=cost,
    )(x, w1, b1, w2, b2)


# --------------------------------------------------------------------------
# Public wrapper: planning (tile sizes, dtype, resident vs tiled) in Python
# --------------------------------------------------------------------------
def mlp_forward(x, w1, b1, w2, b2, *, block_b=512, block_h=None, use_bf16=None,
                vmem_limit_bytes=None, force_tiled=False):
    """Fused Linear->ReLU->Linear forward.

    x: (B, I); w1: (I, H) == fc1.weight.T; b1: (H,);
    w2: (H, O) == out.weight.T; b2: (O,).
    """
    global _SINGLE_BUFFER_WEIGHTS_OK
    B, I = x.shape
    H = w1.shape[1]
    O = w2.shape[1]
    if block_b % 8 != 0:
        raise ValueError("block_b must be a multiple of 8 (TPU sublane rule)")

    if use_bf16 is None:
        # bf16 MXU path (f32 accumulate) pays off at MXU-scale widths;
        # tiny widths stay in the input dtype.
        use_bf16 = min(I, H, O) >= 256
    compute_dtype = jnp.bfloat16 if use_bf16 else x.dtype

    # Weights are cast once (parameters). x is NOT cast here: the per-tile cast
    # happens inside the kernel (free VPU op) to avoid an extra HBM pass over x.
    w1c = w1.astype(compute_dtype)
    w2c = w2.astype(compute_dtype)
    b1_2d = b1.reshape(1, H).astype(jnp.float32)
    b2_2d = b2.reshape(1, O).astype(jnp.float32)

    vmem_budget = (int(vmem_limit_bytes) if vmem_limit_bytes
                   else int(0.8 * _VMEM_CAPACITY))

    cb = jnp.dtype(compute_dtype).itemsize
    xb = jnp.dtype(x.dtype).itemsize
    wbytes = (I * H + H * O) * cb + (H + O) * 4
    # If weights (worst case double-buffered) would eat more than half the VMEM
    # budget (v7x has only 64 MiB), stream them via the H-tiled path instead.
    tiled = force_tiled or (2 * wbytes > vmem_budget // 2)

    # ---- batch tile planning -----------------------------------------------
    per_row = 2 * (I + O) * xb + 4 * (H + O)   # dbl-buffered x/out + f32 h, y
    resident_bytes = 0 if tiled else 2 * wbytes
    avail = max(vmem_budget - resident_bytes - (4 << 20), 8 * per_row)
    tb = min(block_b, avail // per_row,
             max(8, (8 << 20) // max(4 * H, 1)))   # bound live f32 h to ~8 MiB
    tb = max(8, (int(tb) // 8) * 8)
    if tb >= B:
        tb, n_b = B, 1          # full-extent block: no padding, any row count
    else:
        n_b = -(-B // tb)
    if n_b == 1 and B >= 256:
        # Keep >= 2 batch tiles so v7x's two TensorCores both get work.
        tb = ((-(-B // 2)) + 7) // 8 * 8
        n_b = -(-B // tb)

    Bp = n_b * tb
    x_in = x
    if Bp != B:
        # TODO(synk): replace the padded copy with an in-kernel masked tail block.
        x_in = jnp.pad(x, ((0, Bp - B), (0, 0)))

    # ---- hidden tile (tiled path only) --------------------------------------
    th = H
    if tiled:
        if block_h is not None:
            if H % block_h or (block_h % 128 and block_h != H):
                raise ValueError("block_h must divide H and be a multiple of 128")
            th = block_h
        else:
            for cand in (1024, 512, 256, 128):
                if H % cand == 0:
                    th = cand
                    break

    common = dict(tb=tb, th=th, vmem_limit_bytes=int(vmem_budget), tiled=tiled)

    if tiled:
        out = _mlp_pallas(x_in, w1c, b1_2d, w2c, b2_2d,
                          single_buffer_weights=False, **common)
    elif _SINGLE_BUFFER_WEIGHTS_OK is None:
        try:
            out = _mlp_pallas(x_in, w1c, b1_2d, w2c, b2_2d,
                              single_buffer_weights=True, **common)
            _SINGLE_BUFFER_WEIGHTS_OK = True
        except Exception:
            # pl.Buffered(1) unsupported on this jax/Mosaic: fall back to the
            # default double-buffered weight specs (correct, just 2x VMEM).
            _SINGLE_BUFFER_WEIGHTS_OK = False
            out = _mlp_pallas(x_in, w1c, b1_2d, w2c, b2_2d,
                              single_buffer_weights=False, **common)
    else:
        out = _mlp_pallas(x_in, w1c, b1_2d, w2c, b2_2d,
                          single_buffer_weights=_SINGLE_BUFFER_WEIGHTS_OK,
                          **common)

    return out[:B] if Bp != B else out


# --------------------------------------------------------------------------
if __name__ == "__main__":
    # Small shapes consistent with the nn.Module signature, with enough batch
    # rows to exercise the multi-tile grid (2 tiles x 128 rows).
    batch = 256
    input_size = 32
    hidden_size = 64
    output_size = 16

    key = jax.random.PRNGKey(0)
    kx, kw1, kb1, kw2, kb2 = jax.random.split(key, 5)

    x = jax.random.normal(kx, (batch, input_size), dtype=jnp.float32)

    # Deterministic PyTorch-Linear-style init; weights stored as (in, out).
    lim1 = 1.0 / jnp.sqrt(input_size)
    lim2 = 1.0 / jnp.sqrt(hidden_size)
    w1 = jax.random.uniform(kw1, (input_size, hidden_size),
                            minval=-lim1, maxval=lim1, dtype=jnp.float32)
    b1 = jax.random.uniform(kb1, (hidden_size,),
                            minval=-lim1, maxval=lim1, dtype=jnp.float32)
    w2 = jax.random.uniform(kw2, (hidden_size, output_size),
                            minval=-lim2, maxval=lim2, dtype=jnp.float32)
    b2 = jax.random.uniform(kb2, (output_size,),
                            minval=-lim2, maxval=lim2, dtype=jnp.float32)

    y_ref = jnp.maximum(x @ w1 + b1, 0.0) @ w2 + b2

    # 1) f32 resident path, two batch tiles of 128 rows.
    y = mlp_forward(x, w1, b1, w2, b2)
    jax.block_until_ready(y)
    assert y.shape == (batch, output_size)
    assert jnp.allclose(y, y_ref, atol=1e-5, rtol=1e-5), "f32 mismatch vs reference"

    # 2) Ragged small batch: single full-extent block, no padded copy.
    y_odd = mlp_forward(x[:10], w1, b1, w2, b2)
    jax.block_until_ready(y_odd)
    assert jnp.allclose(y_odd, y_ref[:10], atol=1e-5, rtol=1e-5), "ragged mismatch"

    # 3) bf16 MXU path (in-kernel x cast, f32 accumulate) — looser tolerance.
    y_bf16 = mlp_forward(x, w1, b1, w2, b2, use_bf16=True)
    jax.block_until_ready(y_bf16)
    assert jnp.allclose(y_bf16, y_ref, atol=5e-2, rtol=5e-2), "bf16 mismatch"

    # 4) H-tiled fallback path (streams W1/W2 slabs, f32 accumulator + pl.when
    #    init/finalize) — exercised at a small lane-aligned shape (n_h = 2).
    kt = jax.random.split(key, 3)
    xt = jax.random.normal(kt[0], (64, 128), dtype=jnp.float32)
    w1t = jax.random.normal(kt[1], (128, 256), dtype=jnp.float32) * 0.05
    b1t = jnp.zeros((256,), jnp.float32)
    w2t = jax.random.normal(kt[2], (256, 128), dtype=jnp.float32) * 0.05
    b2t = jnp.zeros((128,), jnp.float32)
    yt_ref = jnp.maximum(xt @ w1t + b1t, 0.0) @ w2t + b2t
    yt = mlp_forward(xt, w1t, b1t, w2t, b2t, force_tiled=True, block_h=128)
    jax.block_until_ready(yt)
    # Loose tolerance: chunked-H accumulation order differs from the fused ref.
    assert jnp.allclose(yt, yt_ref, atol=2e-2, rtol=2e-2), "H-tiled mismatch"

    print("KERNEL_OK")
</pallas_src>

<mosaic_0001>
module attributes {stable_mosaic.version = 11 : i64} {
  func.func @_mlp_resident_kernel(%arg0: i32, %arg1: memref<128x32xf32, #tpu.memory_space<vmem>>, %arg2: memref<32x64xf32, #tpu.memory_space<vmem>>, %arg3: memref<1x64xf32, #tpu.memory_space<vmem>>, %arg4: memref<64x16xf32, #tpu.memory_space<vmem>>, %arg5: memref<1x16xf32, #tpu.memory_space<vmem>>, %arg6: memref<128x16xf32, #tpu.memory_space<vmem>>) attributes {dimension_semantics = [#tpu.dimension_semantics<parallel>], iteration_bounds = array<i64: 2>, scalar_prefetch = 0 : i64, scratch_operands = 0 : i64, tpu.core_type = #tpu.core_type<tc>, window_params = [{transform_indices = @transform_0, window_bounds = array<i64: 128, 32>}, {pipeline_mode = #tpu.pipeline_mode<synchronous>, transform_indices = @transform_1, window_bounds = array<i64: 32, 64>}, {pipeline_mode = #tpu.pipeline_mode<synchronous>, transform_indices = @transform_2, window_bounds = array<i64: 1, 64>}, {pipeline_mode = #tpu.pipeline_mode<synchronous>, transform_indices = @transform_3, window_bounds = array<i64: 64, 16>}, {pipeline_mode = #tpu.pipeline_mode<synchronous>, transform_indices = @transform_4, window_bounds = array<i64: 1, 16>}, {transform_indices = @transform_5, window_bounds = array<i64: 128, 16>}]} {
    %c0 = arith.constant 0 : index
    %c0_0 = arith.constant 0 : index
    %0 = vector.load %arg1[%c0, %c0_0] : memref<128x32xf32, #tpu.memory_space<vmem>>, vector<128x32xf32>
    %c0_1 = arith.constant 0 : index
    %c0_2 = arith.constant 0 : index
    %1 = vector.load %arg2[%c0_1, %c0_2] : memref<32x64xf32, #tpu.memory_space<vmem>>, vector<32x64xf32>
    %cst = arith.constant dense<0.000000e+00> : vector<128x64xf32>
    %2 = tpu.matmul %0, %1, %cst {dimension_numbers = #tpu.dot_dimension_numbers<[1], [0], [0], [1], [0, 0, 1, 1], [], []>} : vector<128x32xf32>, vector<32x64xf32>, vector<128x64xf32> -> vector<128x64xf32>
    %c0_3 = arith.constant 0 : index
    %c0_4 = arith.constant 0 : index
    %3 = vector.load %arg3[%c0_3, %c0_4] : memref<1x64xf32, #tpu.memory_space<vmem>>, vector<1x64xf32>
    %4 = vector.broadcast %3 : vector<1x64xf32> to vector<128x64xf32>
    %5 = arith.addf %2, %4 : vector<128x64xf32>
    %cst_5 = arith.constant 0.000000e+00 : f32
    %6 = vector.broadcast %cst_5 : f32 to vector<128x64xf32>
    %7 = arith.maximumf %5, %6 : vector<128x64xf32>
    %c0_6 = arith.constant 0 : index
    %c0_7 = arith.constant 0 : index
    %8 = vector.load %arg4[%c0_6, %c0_7] : memref<64x16xf32, #tpu.memory_space<vmem>>, vector<64x16xf32>
    %cst_8 = arith.constant dense<0.000000e+00> : vector<128x16xf32>
    %9 = tpu.matmul %7, %8, %cst_8 {dimension_numbers = #tpu.dot_dimension_numbers<[1], [0], [0], [1], [0, 0, 1, 1], [], []>} : vector<128x64xf32>, vector<64x16xf32>, vector<128x16xf32> -> vector<128x16xf32>
    %c0_9 = arith.constant 0 : index
    %c0_10 = arith.constant 0 : index
    %10 = vector.load %arg5[%c0_9, %c0_10] : memref<1x16xf32, #tpu.memory_space<vmem>>, vector<1x16xf32>
    %11 = vector.broadcast %10 : vector<1x16xf32> to vector<128x16xf32>
    %12 = arith.addf %9, %11 : vector<128x16xf32>
    %c0_11 = arith.constant 0 : index
    %c0_12 = arith.constant 0 : index
    %13 = vector.load %arg6[%c0_11, %c0_12] : memref<128x16xf32, #tpu.memory_space<vmem>>, vector<128x16xf32>
    tpu.vector_store %arg6[%c0_11, %c0_12], %12 {strides = array<i32>} : memref<128x16xf32, #tpu.memory_space<vmem>>, vector<128x16xf32>,
    return
  }
  func.func @transform_0(%arg0: i32) -> (i32, i32) {
    %c0_i32 = arith.constant 0 : i32
    %c0_i32_0 = arith.constant 0 : i32
    return %arg0, %c0_i32 : i32, i32
  }
  func.func @transform_1(%arg0: i32) -> (i32, i32) {
    %c0_i32 = arith.constant 0 : i32
    %c0_i32_0 = arith.constant 0 : i32
    %c0_i32_1 = arith.constant 0 : i32
    return %c0_i32, %c0_i32_0 : i32, i32
  }
  func.func @transform_2(%arg0: i32) -> (i32, i32) {
    %c0_i32 = arith.constant 0 : i32
    %c0_i32_0 = arith.constant 0 : i32
    %c0_i32_1 = arith.constant 0 : i32
    return %c0_i32, %c0_i32_0 : i32, i32
  }
  func.func @transform_3(%arg0: i32) -> (i32, i32) {
    %c0_i32 = arith.constant 0 : i32
    %c0_i32_0 = arith.constant 0 : i32
    %c0_i32_1 = arith.constant 0 : i32
    return %c0_i32, %c0_i32_0 : i32, i32
  }
  func.func @transform_4(%arg0: i32) -> (i32, i32) {
    %c0_i32 = arith.constant 0 : i32
    %c0_i32_0 = arith.constant 0 : i32
    %c0_i32_1 = arith.constant 0 : i32
    return %c0_i32, %c0_i32_0 : i32, i32
  }
  func.func @transform_5(%arg0: i32) -> (i32, i32) {
    %c0_i32 = arith.constant 0 : i32
    %c0_i32_0 = arith.constant 0 : i32
    return %arg0, %c0_i32 : i32, i32
  }
}

module attributes {stable_mosaic.version = 11 : i64} {
  func.func @_mlp_resident_kernel(%arg0: i32, %arg1: memref<128x32xf32, #tpu.memory_space<vmem>>, %arg2: memref<32x64xf32, #tpu.memory_space<vmem>>, %arg3: memref<1x64xf32, #tpu.memory_space<vmem>>, %arg4: memref<64x16xf32, #tpu.memory_space<vmem>>, %arg5: memref<1x16xf32, #tpu.memory_space<vmem>>, %arg6: memref<128x16xf32, #tpu.memory_space<vmem>>) attributes {dimension_semantics = [#tpu.dimension_semantics<parallel>], iteration_bounds = array<i64: 2>, scalar_prefetch = 0 : i64, scratch_operands = 0 : i64, tpu.core_type = #tpu.core_type<tc>, window_params = [{transform_indices = @transform_0, window_bounds = array<i64: 128, 32>}, {pipeline_mode = #tpu.pipeline_mode<synchronous>, transform_indices = @transform_1, window_bounds = array<i64: 32, 64>}, {pipeline_mode = #tpu.pipeline_mode<synchronous>, transform_indices = @transform_2, window_bounds = array<i64: 1, 64>}, {pipeline_mode = #tpu.pipeline_mode<synchronous>, transform_indices = @transform_3, window_bounds = array<i64: 64, 16>}, {pipeline_mode = #tpu.pipeline_mode<synchronous>, transform_indices = @transform_4, window_bounds = array<i64: 1, 16>}, {transform_indices = @transform_5, window_bounds = array<i64: 128, 16>}]} {
    %c0 = arith.constant 0 : index
    %c0_0 = arith.constant 0 : index
    %0 = vector.load %arg1[%c0, %c0_0] : memref<128x32xf32, #tpu.memory_space<vmem>>, vector<128x32xf32>
    %c0_1 = arith.constant 0 : index
    %c0_2 = arith.constant 0 : index
    %1 = vector.load %arg2[%c0_1, %c0_2] : memref<32x64xf32, #tpu.memory_space<vmem>>, vector<32x64xf32>
    %cst = arith.constant dense<0.000000e+00> : vector<128x64xf32>
    %2 = tpu.matmul %0, %1, %cst {dimension_numbers = #tpu.dot_dimension_numbers<[1], [0], [0], [1], [0, 0, 1, 1], [], []>} : vector<128x32xf32>, vector<32x64xf32>, vector<128x64xf32> -> vector<128x64xf32>
    %c0_3 = arith.constant 0 : index
    %c0_4 = arith.constant 0 : index
    %3 = vector.load %arg3[%c0_3, %c0_4] : memref<1x64xf32, #tpu.memory_space<vmem>>, vector<1x64xf32>
    %4 = vector.broadcast %3 : vector<1x64xf32> to vector<128x64xf32>
    %5 = arith.addf %2, %4 : vector<128x64xf32>
    %cst_5 = arith.constant 0.000000e+00 : f32
    %6 = vector.broadcast %cst_5 : f32 to vector<128x64xf32>
    %7 = arith.maximumf %5, %6 : vector<128x64xf32>
    %c0_6 = arith.constant 0 : index
    %c0_7 = arith.constant 0 : index
    %8 = vector.load %arg4[%c0_6, %c0_7] : memref<64x16xf32, #tpu.memory_space<vmem>>, vector<64x16xf32>
    %cst_8 = arith.constant dense<0.000000e+00> : vector<128x16xf32>
    %9 = tpu.matmul %7, %8, %cst_8 {dimension_numbers = #tpu.dot_dimension_numbers<[1], [0], [0], [1], [0, 0, 1, 1], [], []>} : vector<128x64xf32>, vector<64x16xf32>, vector<128x16xf32> -> vector<128x16xf32>
    %c0_9 = arith.constant 0 : index
    %c0_10 = arith.constant 0 : index
    %10 = vector.load %arg5[%c0_9, %c0_10] : memref<1x16xf32, #tpu.memory_space<vmem>>, vector<1x16xf32>
    %11 = vector.broadcast %10 : vector<1x16xf32> to vector<128x16xf32>
    %12 = arith.addf %9, %11 : vector<128x16xf32>
    %c0_11 = arith.constant 0 : index
    %c0_12 = arith.constant 0 : index
    %13 = vector.load %arg6[%c0_11, %c0_12] : memref<128x16xf32, #tpu.memory_space<vmem>>, vector<128x16xf32>
    tpu.vector_store %arg6[%c0_11, %c0_12], %12 {strides = array<i32>} : memref<128x16xf32, #tpu.memory_space<vmem>>, vector<128x16xf32>,
    return
  }
  func.func @transform_0(%arg0: i32) -> (i32, i32) {
    %c0_i32 = arith.constant 0 : i32
    %c0_i32_0 = arith.constant 0 : i32
    return %arg0, %c0_i32 : i32, i32
  }
  func.func @transform_1(%arg0: i32) -> (i32, i32) {
    %c0_i32 = arith.constant 0 : i32
    %c0_i32_0 = arith.constant 0 : i32
    %c0_i32_1 = arith.constant 0 : i32
    return %c0_i32, %c0_i32_0 : i32, i32
  }
  func.func @transform_2(%arg0: i32) -> (i32, i32) {
    %c0_i32 = arith.constant 0 : i32
    %c0_i32_0 = arith.constant 0 : i32
    %c0_i32_1 = arith.constant 0 : i32
    return %c0_i32, %c0_i32_0 : i32, i32
  }
  func.func @transform_3(%arg0: i32) -> (i32, i32) {
    %c0_i32 = arith.constant 0 : i32
    %c0_i32_0 = arith.constant 0 : i32
    %c0_i32_1 = arith.constant 0 : i32
    return %c0_i32, %c0_i32_0 : i32, i32
  }
  func.func @transform_4(%arg0: i32) -> (i32, i32) {
    %c0_i32 = arith.constant 0 : i32
    %c0_i32_0 = arith.constant 0 : i32
    %c0_i32_1 = arith.constant 0 : i32
    return %c0_i32, %c0_i32_0 : i32, i32
  }
  func.func @transform_5(%arg0: i32) -> (i32, i32) {
    %c0_i32 = arith.constant 0 : i32
    %c0_i32_0 = arith.constant 0 : i32
    return %arg0, %c0_i32 : i32, i32
  }
}

</mosaic_0001>

<bundles_post_ra>
// kernel: _mlp_pallas.1
= control target key start
LH: loop header
LB: loop body
LE: loop exit
PB: predicated region body
PF: predicated region fallthrough
CT: control target
= control target key end

     0   :  { %s986_s18 = smov 0   ;;  %s1136_s0 = inlined_call_operand.vmem [shape: f32[256,32], index: 0, kind: input, shape index: {}]   ;;  %s1137_s1 = inlined_call_operand.vmem [shape: f32[32,64], index: 1, kind: input, shape index: {}]   ;;  %s1138_s2 = inlined_call_operand.vmem [shape: f32[1,64], index: 2, kind: input, shape index: {}]   ;;  %s1139_s3 = inlined_call_operand.vmem [shape: f32[64,16], index: 3, kind: input, shape index: {}]   ;;  %s1140_s4 = inlined_call_operand.vmem [shape: f32[1,16], index: 4, kind: input, shape index: {}]   ;;  %s1141_s5 = inlined_call_operand.vmem [shape: f32[256,16], index: 5, kind: output, shape index: {}]  }
   0x1 LB: > { %s747_s19 = sadd.s32 4294967295, %s954_s18   ;;  %p751_p0 = scmp.ge.s32.totalorder %s954_s18, 1  ;;  %s954_s18 = sphi %s986_s18, %s15_s18  }
   0x2   : > { %p188_p1 = scmp.lt.s32.totalorder %s954_s18, 3 }
   0x4   : > { %p189_p2 = pnand %p751_p0, %p188_p1 }
   0x5   : > { %v244_v0 = vld [vmem:[%s1137_s1] sm:$0xff] (!%p189_p2)  ;;  %v245_v1 = vld [vmem:[%s1137_s1 + $0x8] sm:$0xff] (!%p189_p2)  ;;  %v246_v2 = vld [vmem:[%s1137_s1 + $0x10] sm:$0xff] (!%p189_p2)  ;;  %s752_s26 = sshll.u32 (!%p189_p2), %s747_s19, 4  ;;  %vm255_vm0 = vcmask (!%p189_p2), 261120   ;;  %vm480_vm1 = vcmask (!%p189_p2), 523264  }
   0x6   : > { %192 = sbr.rel (%p189_p2) target bundleno = 480 (0x1e0), region = 40  ;;  %v908_v3 = vpack.c.bf16 (!%p189_p2), %v245_v1, %v244_v0  ;;  %v247_v4 = vld [vmem:[%s1137_s1 + $0x18] sm:$0xff] (!%p189_p2)  ;;  %p217_p3 = scmp.lt.s32.totalorder (!%p189_p2), %s752_s26, 31  ;;  %v465_v5 = vld [vmem:[%s1139_s3] sm:$0xff] (!%p189_p2)  ;;  %v466_v6 = vld [vmem:[%s1139_s3 + $0x8] sm:$0xff] (!%p189_p2)  ;;  %vm674_vm2 = vcmask (!%p189_p2), 130048  }
   0x7   : > { %v912_v7 = vpack.c.bf16 (!%p189_p2), %v247_v4, %v246_v2  ;;  %v916_v8 = vpack.c.bf16 (!%p189_p2), %v466_v6, %v465_v5  ;;  %v467_v9 = vld [vmem:[%s1139_s3 + $0x10] sm:$0xff] (!%p189_p2)  ;;  %v468_v10 = vld [vmem:[%s1139_s3 + $0x18] sm:$0xff] (!%p189_p2)  ;;  %v469_v12 = vld [vmem:[%s1139_s3 + $0x20] sm:$0xff] (!%p189_p2) }
   0x8   : > { %909 = vmatprep.subr.bf16.mxu0 (!%p189_p2), %v908_v3  ;;  %v920_v11 = vpack.c.bf16 (!%p189_p2), %v468_v10, %v467_v9  ;;  %v470_v13 = vld [vmem:[%s1139_s3 + $0x28] sm:$0xff] (!%p189_p2)  ;;  %v471_v31 = vld [vmem:[%s1139_s3 + $0x30] sm:$0xff] (!%p189_p2)  ;;  %v472_v32 = vld [vmem:[%s1139_s3 + $0x38] sm:$0xff] (!%p189_p2) }
   0x9   : > { %911 = vmatpush3.bf16.msra.mxu0 (!%p189_p2), %v908_v3  ;;  %932 = vmatprep.subr.bf16.mxu1 (!%p189_p2), %v916_v8  ;;  %v924_v16 = vpack.c.bf16 (!%p189_p2), %v470_v13, %v469_v12  ;;  %v928_v33 = vpack.c.bf16 (!%p189_p2), %v472_v32, %v471_v31  ;;  %v756_v34 = vld [vmem:[%s1138_s2] ss:$0 sm:$0xff] (!%p189_p2) }
   0xa   : > { %913 = vmatprep.subr.bf16.mxu0 (!%p189_p2), %v912_v7  ;;  %936 = vmatpush3.bf16.msra.mxu1 (!%p189_p2), %v916_v8 }
   0xb   : > { %933 = vmatprep.subr.bf16.mxu1 (!%p189_p2), %v920_v11 }
   0xd   : > { %s1143_s26 = smov (!%p217_p3, %s752_s26), 31  ;;  %915 = vmatpush3.bf16.msra.mxu0 %v912_v7 }
   0xe   : > { %s753_s12 = sshll.u32 %s1143_s26, 3  ;;  %917 = vmatprep.subr.bf16.mxu0 %v916_v8  ;;  %937 = vmatpush3.bf16.msra.mxu1 %v920_v11 }
   0xf   : > { %s1032_s20 = scalar_lea.vmem %s1136_s0, %s753_s12  ;;  %934 = vmatprep.subr.bf16.mxu1 %v924_v16  ;;  %s1099_s7 = scalar_lea.vmem %s1141_s5, %s753_s12 }
  0x10   : > { %v228_v14 = vld [vmem:[%s1032_s20] sm:$0xff]  ;;  %v229_v15 = vld [vmem:[%s1032_s20 + $0x8] sm:$0xff]  ;;  %v230_v17 = vld [vmem:[%s1032_s20 + $0x10] sm:$0xff] }
  0x11   : > { %844 = vmatprep.mubr.msk.f32.mxu0 %vm255_vm0, %v228_v14  ;;  %v231_v18 = vld [vmem:[%s1032_s20 + $0x18] sm:$0xff]  ;;  %v232_v19 = vld [vmem:[%s1032_s20 + $0x20] sm:$0xff]  ;;  %v233_v20 = vld [vmem:[%s1032_s20 + $0x28] sm:$0xff] }
  0x12   : > { %845 = vmatmul.mubr.msk.f32.vlgmr.msra.gmra.mrb[0].mxu0 %vm255_vm0, %v229_v15  ;;  %938 = vmatpush3.bf16.msra.mxu1 %v924_v16  ;;  %v234_v21 = vld [vmem:[%s1032_s20 + $0x30] sm:$0xff]  ;;  %v235_v22 = vld [vmem:[%s1032_s20 + $0x38] sm:$0xff]  ;;  %v236_v23 = vld [vmem:[%s1032_s20 + $0x40] sm:$0xff] }
  0x13   : > { %847 = vmatprep.mubr.msk.f32.mxu0 %vm255_vm0, %v230_v17  ;;  %919 = vmatpush3.bf16.msra.mxu0 %v916_v8  ;;  %v237_v24 = vld [vmem:[%s1032_s20 + $0x48] sm:$0xff]  ;;  %v238_v25 = vld [vmem:[%s1032_s20 + $0x50] sm:$0xff]  ;;  %v239_v26 = vld [vmem:[%s1032_s20 + $0x58] sm:$0xff] }
  0x14   : > { %921 = vmatprep.subr.bf16.mxu0 %v920_v11  ;;  %v240_v27 = vld [vmem:[%s1032_s20 + $0x60] sm:$0xff]  ;;  %v241_v28 = vld [vmem:[%s1032_s20 + $0x68] sm:$0xff]  ;;  %v242_v29 = vld [vmem:[%s1032_s20 + $0x70] sm:$0xff]  ;;  %935 = vmatprep.subr.bf16.mxu1 %v928_v33 }
  0x15   : > { %v243_v30 = vld [vmem:[%s1032_s20 + $0x78] sm:$0xff] }
  0x16   : > { %848 = vmatmul.mubr.msk.f32.gmra.mrb[2].mxu0 %vm255_vm0, %v231_v18  ;;  %939 = vmatpush3.bf16.msra.mxu1 %v928_v33 }
  0x17   : > { %850 = vmatprep.mubr.msk.f32.mxu0 %vm255_vm0, %v232_v19  ;;  %923 = vmatpush3.bf16.msra.mxu0 %v920_v11  ;;  %v773_v19 = vld [vmem:[%s1140_s4] ss:$0 sm:$0xff] }
  0x18   : > { %925 = vmatprep.subr.bf16.mxu0 %v924_v16 }
  0x1a   : > { %851 = vmatmul.mubr.msk.f32.gmra.mrb[4].mxu0 %vm255_vm0, %v233_v20 }
  0x1b   : > { %853 = vmatprep.mubr.msk.f32.mxu0 %vm255_vm0, %v234_v21  ;;  %927 = vmatpush3.bf16.msra.mxu0 %v924_v16 }
  0x1c   : > { %929 = vmatprep.subr.bf16.mxu0 %v928_v33 }
  0x1e   : > { %854 = vmatmul.mubr.msk.f32.gmra.mrb[6].mxu0 %vm255_vm0, %v235_v22 }
  0x1f   : > { %856 = vmatprep.mubr.msk.f32.mxu0 %vm255_vm0, %v236_v23  ;;  %931 = vmatpush3.bf16.msra.mxu0 %v928_v33 }
  0x22   : > { %857 = vmatmul.mubr.msk.f32.gmra.mrb[8].mxu0 %vm255_vm0, %v237_v24 }
  0x23   : > { %859 = vmatprep.mubr.msk.f32.mxu0 %vm255_vm0, %v238_v25 }
  0x26   : > { %860 = vmatmul.mubr.msk.f32.gmra.mrb[10].mxu0 %vm255_vm0, %v239_v26 }
  0x27   : > { %862 = vmatprep.mubr.msk.f32.mxu0 %vm255_vm0, %v240_v27 }
  0x2a   : > { %863 = vmatmul.mubr.msk.f32.gmra.mrb[12].mxu0 %vm255_vm0, %v241_v28 }
  0x2b   : > { %865 = vmatprep.mubr.msk.f32.mxu0 %vm255_vm0, %v242_v29 }
  0x2e   : > { %866 = vmatmul.mubr.msk.f32.gmra.mrb[14].mxu0 %vm255_vm0, %v243_v30 }
  0xe5   : > { %v846_v35 = vpop.f32.mrb[0].mxu0 }
  0xe6   : > { %v376_v36 = vadd.f32 %v846_v35, %v756_v34  ;;  %v370_v37 = vpop.f32.mrb[1].mxu0 }
  0xe7   : > { %v371_v38 = vadd.f32 %v756_v34, %v370_v37 }
  0xe8   : > { %v450_v41 = vmax.f32 %v376_v36, 0.0 }
  0xe9   : > { %v449_v39 = vmax.f32 %v371_v38, 0.0  ;;  %v849_v40 = vpop.f32.mrb[2].mxu0 }
  0xea   : > { %v386_v42 = vadd.f32 %v849_v40, %v756_v34  ;;  %v380_v43 = vpop.f32.mrb[3].mxu0 }
  0xeb   : > { %v381_v44 = vadd.f32 %v756_v34, %v380_v43  ;;  %884 = vmatprep.mubr.msk.f32.mxu0 %vm480_vm1, %v449_v39 }
  0xec   : > { %885 = vmatmul.mubr.msk.f32.vlgmr.msra.gmra.mrb[16].mxu0 %vm480_vm1, %v450_v41  ;;  %v452_v47 = vmax.f32 %v386_v42, 0.0 }
  0xed   : > { %v451_v45 = vmax.f32 %v381_v44, 0.0  ;;  %v852_v46 = vpop.f32.mrb[4].mxu0 }
  0xee   : > { %v396_v48 = vadd.f32 %v852_v46, %v756_v34  ;;  %v390_v49 = vpop.f32.mrb[5].mxu0 }
  0xef   : > { %v391_v50 = vadd.f32 %v756_v34, %v390_v49  ;;  %887 = vmatprep.mubr.msk.f32.mxu1 %vm480_vm1, %v451_v45 }
  0xf0   : > { %888 = vmatmul.mubr.msk.f32.vlgmr.msra.gmra.mrb[0].mxu1 %vm480_vm1, %v452_v47  ;;  %v454_v53 = vmax.f32 %v396_v48, 0.0 }
  0xf1   : > { %v453_v51 = vmax.f32 %v391_v50, 0.0  ;;  %v855_v52 = vpop.f32.mrb[6].mxu0 }
  0xf2   : > { %v406_v54 = vadd.f32 %v855_v52, %v756_v34  ;;  %v400_v55 = vpop.f32.mrb[7].mxu0 }
  0xf3   : > { %v401_v56 = vadd.f32 %v756_v34, %v400_v55  ;;  %890 = vmatprep.mubr.msk.f32.mxu1 %vm480_vm1, %v453_v51 }
  0xf4   : > { %891 = vmatmul.mubr.msk.f32.gmra.mrb[2].mxu1 %vm480_vm1, %v454_v53  ;;  %v456_v59 = vmax.f32 %v406_v54, 0.0 }
  0xf5   : > { %v455_v57 = vmax.f32 %v401_v56, 0.0  ;;  %v858_v58 = vpop.f32.mrb[8].mxu0 }
  0xf6   : > { %v416_v60 = vadd.f32 %v858_v58, %v756_v34  ;;  %v410_v61 = vpop.f32.mrb[9].mxu0 }
  0xf7   : > { %v411_v62 = vadd.f32 %v756_v34, %v410_v61  ;;  %893 = vmatprep.mubr.msk.f32.mxu1 %vm480_vm1, %v455_v57 }
  0xf8   : > { %894 = vmatmul.mubr.msk.f32.gmra.mrb[4].mxu1 %vm480_vm1, %v456_v59  ;;  %v458_v1 = vmax.f32 %v416_v60, 0.0 }
  0xf9   : > { %v457_v63 = vmax.f32 %v411_v62, 0.0  ;;  %v861_v0 = vpop.f32.mrb[10].mxu0 }
  0xfa   : > { %v426_v2 = vadd.f32 %v861_v0, %v756_v34  ;;  %v420_v3 = vpop.f32.mrb[11].mxu0 }
  0xfb   : > { %v421_v4 = vadd.f32 %v756_v34, %v420_v3  ;;  %896 = vmatprep.mubr.msk.f32.mxu1 %vm480_vm1, %v457_v63 }
  0xfc   : > { %897 = vmatmul.mubr.msk.f32.gmra.mrb[6].mxu1 %vm480_vm1, %v458_v1  ;;  %v460_v7 = vmax.f32 %v426_v2, 0.0 }
  0xfd   : > { %v459_v5 = vmax.f32 %v421_v4, 0.0  ;;  %v864_v6 = vpop.f32.mrb[12].mxu0 }
  0xfe   : > { %v436_v8 = vadd.f32 %v864_v6, %v756_v34  ;;  %v430_v9 = vpop.f32.mrb[13].mxu0 }
  0xff   : > { %v431_v10 = vadd.f32 %v756_v34, %v430_v9  ;;  %899 = vmatprep.mubr.msk.f32.mxu1 %vm480_vm1, %v459_v5 }
 0x100   : > { %900 = vmatmul.mubr.msk.f32.gmra.mrb[8].mxu1 %vm480_vm1, %v460_v7  ;;  %v462_v13 = vmax.f32 %v436_v8, 0.0 }
 0x101   : > { %v461_v11 = vmax.f32 %v431_v10, 0.0  ;;  %v867_v12 = vpop.f32.mrb[14].mxu0 }
 0x102   : > { %v446_v14 = vadd.f32 %v867_v12, %v756_v34  ;;  %v440_v15 = vpop.f32.mrb[15].mxu0 }
 0x103   : > { %v441_v16 = vadd.f32 %v756_v34, %v440_v15  ;;  %902 = vmatprep.mubr.msk.f32.mxu1 %vm480_vm1, %v461_v11 }
 0x104   : > { %903 = vmatmul.mubr.msk.f32.gmra.mrb[10].mxu1 %vm480_vm1, %v462_v13  ;;  %v464_v18 = vmax.f32 %v446_v14, 0.0 }
 0x105   : > { %v463_v17 = vmax.f32 %v441_v16, 0.0 }
 0x107   : > { %905 = vmatprep.mubr.msk.f32.mxu1 %vm480_vm1, %v463_v17 }
 0x108   : > { %906 = vmatmul.mubr.msk.f32.gmra.mrb[12].mxu1 %vm480_vm1, %v464_v18 }
 0x1bf   : > { %v886_v20 = vpop.f32.mrb[16].mxu0 }
 0x1c0   : > { %v601_v21 = vadd.f32 %v886_v20, %v773_v19  ;;  %v595_v22 = vpop.f32.mrb[17].mxu0 }
 0x1c1   : > { %v596_v23 = vadd.f32 %v773_v19, %v595_v22 }
 0x1c2   : > { %676 = vst.msk [vmem:[%s1099_s7 + $0x8] sm:$0xff] %vm674_vm2, %v601_v21 }
 0x1c3   : > { %675 = vst.msk [vmem:[%s1099_s7] sm:$0xff] %vm674_vm2, %v596_v23  ;;  %v889_v24 = vpop.f32.mrb[0].mxu1 }
 0x1c4   : > { %v611_v25 = vadd.f32 %v889_v24, %v773_v19  ;;  %v605_v26 = vpop.f32.mrb[1].mxu1 }
 0x1c5   : > { %v606_v27 = vadd.f32 %v773_v19, %v605_v26 }
 0x1c6   : > { %678 = vst.msk [vmem:[%s1099_s7 + $0x18] sm:$0xff] %vm674_vm2, %v611_v25 }
 0x1c7   : > { %677 = vst.msk [vmem:[%s1099_s7 + $0x10] sm:$0xff] %vm674_vm2, %v606_v27  ;;  %v892_v28 = vpop.f32.mrb[2].mxu1 }
 0x1c8   : > { %v621_v29 = vadd.f32 %v892_v28, %v773_v19  ;;  %v615_v30 = vpop.f32.mrb[3].mxu1 }
 0x1c9   : > { %v616_v31 = vadd.f32 %v773_v19, %v615_v30 }
 0x1ca   : > { %680 = vst.msk [vmem:[%s1099_s7 + $0x28] sm:$0xff] %vm674_vm2, %v621_v29 }
 0x1cb   : > { %679 = vst.msk [vmem:[%s1099_s7 + $0x20] sm:$0xff] %vm674_vm2, %v616_v31  ;;  %v895_v32 = vpop.f32.mrb[4].mxu1 }
 0x1cc   : > { %v631_v33 = vadd.f32 %v895_v32, %v773_v19  ;;  %v625_v34 = vpop.f32.mrb[5].mxu1 }
 0x1cd   : > { %v626_v35 = vadd.f32 %v773_v19, %v625_v34 }
 0x1ce   : > { %682 = vst.msk [vmem:[%s1099_s7 + $0x38] sm:$0xff] %vm674_vm2, %v631_v33 }
 0x1cf   : > { %681 = vst.msk [vmem:[%s1099_s7 + $0x30] sm:$0xff] %vm674_vm2, %v626_v35  ;;  %v898_v36 = vpop.f32.mrb[6].mxu1 }
 0x1d0   : > { %v641_v37 = vadd.f32 %v898_v36, %v773_v19  ;;  %v635_v38 = vpop.f32.mrb[7].mxu1 }
 0x1d1   : > { %v636_v39 = vadd.f32 %v773_v19, %v635_v38 }
 0x1d2   : > { %684 = vst.msk [vmem:[%s1099_s7 + $0x48] sm:$0xff] %vm674_vm2, %v641_v37 }
 0x1d3   : > { %683 = vst.msk [vmem:[%s1099_s7 + $0x40] sm:$0xff] %vm674_vm2, %v636_v39  ;;  %v901_v40 = vpop.f32.mrb[8].mxu1 }
 0x1d4   : > { %v651_v41 = vadd.f32 %v901_v40, %v773_v19  ;;  %v645_v42 = vpop.f32.mrb[9].mxu1 }
 0x1d5   : > { %v646_v43 = vadd.f32 %v773_v19, %v645_v42 }
 0x1d6   : > { %686 = vst.msk [vmem:[%s1099_s7 + $0x58] sm:$0xff] %vm674_vm2, %v651_v41 }
 0x1d7   : > { %685 = vst.msk [vmem:[%s1099_s7 + $0x50] sm:$0xff] %vm674_vm2, %v646_v43  ;;  %v904_v44 = vpop.f32.mrb[10].mxu1 }
 0x1d8   : > { %v661_v45 = vadd.f32 %v904_v44, %v773_v19  ;;  %v655_v46 = vpop.f32.mrb[11].mxu1 }
 0x1d9   : > { %v656_v47 = vadd.f32 %v773_v19, %v655_v46 }
 0x1da   : > { %688 = vst.msk [vmem:[%s1099_s7 + $0x68] sm:$0xff] %vm674_vm2, %v661_v45 }
 0x1db   : > { %687 = vst.msk [vmem:[%s1099_s7 + $0x60] sm:$0xff] %vm674_vm2, %v656_v47  ;;  %v907_v48 = vpop.f32.mrb[12].mxu1 }
 0x1dc   : > { %v671_v49 = vadd.f32 %v907_v48, %v773_v19  ;;  %v665_v50 = vpop.f32.mrb[13].mxu1 }
 0x1dd   : > { %v666_v51 = vadd.f32 %v773_v19, %v665_v50 }
 0x1de   : > { %690 = vst.msk [vmem:[%s1099_s7 + $0x78] sm:$0xff] %vm674_vm2, %v671_v49 }
 0x1df   : > { %689 = vst.msk [vmem:[%s1099_s7 + $0x70] sm:$0xff] %vm674_vm2, %v666_v51 }
 0x1e0 PF: > { %s15_s18 = sadd.s32 1, %s954_s18  }
 0x1e1   : > { %p12_p4 = scmp.ge.s32.totalorder %s15_s18, 4  }
 0x1e3   :  { %14 = sbr.rel (!%p12_p4) target bundleno = 1 (0x1), region = 70 }

// kernel: _mlp_pallas.1
= control target key start
LH: loop header
LB: loop body
LE: loop exit
PB: predicated region body
PF: predicated region fallthrough
CT: control target
= control target key end

     0   :  { %s986_s18 = smov 0   ;;  %s1136_s0 = inlined_call_operand.vmem [shape: f32[256,32], index: 0, kind: input, shape index: {}]   ;;  %s1137_s1 = inlined_call_operand.vmem [shape: f32[32,64], index: 1, kind: input, shape index: {}]   ;;  %s1138_s2 = inlined_call_operand.vmem [shape: f32[1,64], index: 2, kind: input, shape index: {}]   ;;  %s1139_s3 = inlined_call_operand.vmem [shape: f32[64,16], index: 3, kind: input, shape index: {}]   ;;  %s1140_s4 = inlined_call_operand.vmem [shape: f32[1,16], index: 4, kind: input, shape index: {}]   ;;  %s1141_s5 = inlined_call_operand.vmem [shape: f32[256,16], index: 5, kind: output, shape index: {}]  }
   0x1 LB: > { %s747_s19 = sadd.s32 4294967295, %s954_s18   ;;  %p751_p0 = scmp.ge.s32.totalorder %s954_s18, 1  ;;  %s954_s18 = sphi %s986_s18, %s15_s18  }
   0x2   : > { %p188_p1 = scmp.lt.s32.totalorder %s954_s18, 3 }
   0x4   : > { %p189_p2 = pnand %p751_p0, %p188_p1 }
   0x5   : > { %v244_v0 = vld [vmem:[%s1137_s1] sm:$0xff] (!%p189_p2)  ;;  %v245_v1 = vld [vmem:[%s1137_s1 + $0x8] sm:$0xff] (!%p189_p2)  ;;  %v246_v2 = vld [vmem:[%s1137_s1 + $0x10] sm:$0xff] (!%p189_p2)  ;;  %s752_s26 = sshll.u32 (!%p189_p2), %s747_s19, 4  ;;  %vm255_vm0 = vcmask (!%p189_p2), 261120   ;;  %vm480_vm1 = vcmask (!%p189_p2), 523264  }
   0x6   : > { %192 = sbr.rel (%p189_p2) target bundleno = 480 (0x1e0), region = 40  ;;  %v908_v3 = vpack.c.bf16 (!%p189_p2), %v245_v1, %v244_v0  ;;  %v247_v4 = vld [vmem:[%s1137_s1 + $0x18] sm:$0xff] (!%p189_p2)  ;;  %p217_p3 = scmp.lt.s32.totalorder (!%p189_p2), %s752_s26, 31  ;;  %v465_v5 = vld [vmem:[%s1139_s3] sm:$0xff] (!%p189_p2)  ;;  %v466_v6 = vld [vmem:[%s1139_s3 + $0x8] sm:$0xff] (!%p189_p2)  ;;  %vm674_vm2 = vcmask (!%p189_p2), 130048  }
   0x7   : > { %v912_v7 = vpack.c.bf16 (!%p189_p2), %v247_v4, %v246_v2  ;;  %v916_v8 = vpack.c.bf16 (!%p189_p2), %v466_v6, %v465_v5  ;;  %v467_v9 = vld [vmem:[%s1139_s3 + $0x10] sm:$0xff] (!%p189_p2)  ;;  %v468_v10 = vld [vmem:[%s1139_s3 + $0x18] sm:$0xff] (!%p189_p2)  ;;  %v469_v12 = vld [vmem:[%s1139_s3 + $0x20] sm:$0xff] (!%p189_p2) }
   0x8   : > { %909 = vmatprep.subr.bf16.mxu0 (!%p189_p2), %v908_v3  ;;  %v920_v11 = vpack.c.bf16 (!%p189_p2), %v468_v10, %v467_v9  ;;  %v470_v13 = vld [vmem:[%s1139_s3 + $0x28] sm:$0xff] (!%p189_p2)  ;;  %v471_v31 = vld [vmem:[%s1139_s3 + $0x30] sm:$0xff] (!%p189_p2)  ;;  %v472_v32 = vld [vmem:[%s1139_s3 + $0x38] sm:$0xff] (!%p189_p2) }
   0x9   : > { %911 = vmatpush3.bf16.msra.mxu0 (!%p189_p2), %v908_v3  ;;  %932 = vmatprep.subr.bf16.mxu1 (!%p189_p2), %v916_v8  ;;  %v924_v16 = vpack.c.bf16 (!%p189_p2), %v470_v13, %v469_v12  ;;  %v928_v33 = vpack.c.bf16 (!%p189_p2), %v472_v32, %v471_v31  ;;  %v756_v34 = vld [vmem:[%s1138_s2] ss:$0 sm:$0xff] (!%p189_p2) }
   0xa   : > { %913 = vmatprep.subr.bf16.mxu0 (!%p189_p2), %v912_v7  ;;  %936 = vmatpush3.bf16.msra.mxu1 (!%p189_p2), %v916_v8 }
   0xb   : > { %933 = vmatprep.subr.bf16.mxu1 (!%p189_p2), %v920_v11 }
   0xd   : > { %s1143_s26 = smov (!%p217_p3, %s752_s26), 31  ;;  %915 = vmatpush3.bf16.msra.mxu0 %v912_v7 }
   0xe   : > { %s753_s12 = sshll.u32 %s1143_s26, 3  ;;  %917 = vmatprep.subr.bf16.mxu0 %v916_v8  ;;  %937 = vmatpush3.bf16.msra.mxu1 %v920_v11 }
   0xf   : > { %s1032_s20 = scalar_lea.vmem %s1136_s0, %s753_s12  ;;  %934 = vmatprep.subr.bf16.mxu1 %v924_v16  ;;  %s1099_s7 = scalar_lea.vmem %s1141_s5, %s753_s12 }
  0x10   : > { %v228_v14 = vld [vmem:[%s1032_s20] sm:$0xff]  ;;  %v229_v15 = vld [vmem:[%s1032_s20 + $0x8] sm:$0xff]  ;;  %v230_v17 = vld [vmem:[%s1032_s20 + $0x10] sm:$0xff] }
  0x11   : > { %844 = vmatprep.mubr.msk.f32.mxu0 %vm255_vm0, %v228_v14  ;;  %v231_v18 = vld [vmem:[%s1032_s20 + $0x18] sm:$0xff]  ;;  %v232_v19 = vld [vmem:[%s1032_s20 + $0x20] sm:$0xff]  ;;  %v233_v20 = vld [vmem:[%s1032_s20 + $0x28] sm:$0xff] }
  0x12   : > { %845 = vmatmul.mubr.msk.f32.vlgmr.msra.gmra.mrb[0].mxu0 %vm255_vm0, %v229_v15  ;;  %938 = vmatpush3.bf16.msra.mxu1 %v924_v16  ;;  %v234_v21 = vld [vmem:[%s1032_s20 + $0x30] sm:$0xff]  ;;  %v235_v22 = vld [vmem:[%s1032_s20 + $0x38] sm:$0xff]  ;;  %v236_v23 = vld [vmem:[%s1032_s20 + $0x40] sm:$0xff] }
  0x13   : > { %847 = vmatprep.mubr.msk.f32.mxu0 %vm255_vm0, %v230_v17  ;;  %919 = vmatpush3.bf16.msra.mxu0 %v916_v8  ;;  %v237_v24 = vld [vmem:[%s1032_s20 + $0x48] sm:$0xff]  ;;  %v238_v25 = vld [vmem:[%s1032_s20 + $0x50] sm:$0xff]  ;;  %v239_v26 = vld [vmem:[%s1032_s20 + $0x58] sm:$0xff] }
  0x14   : > { %921 = vmatprep.subr.bf16.mxu0 %v920_v11  ;;  %v240_v27 = vld [vmem:[%s1032_s20 + $0x60] sm:$0xff]  ;;  %v241_v28 = vld [vmem:[%s1032_s20 + $0x68] sm:$0xff]  ;;  %v242_v29 = vld [vmem:[%s1032_s20 + $0x70] sm:$0xff]  ;;  %935 = vmatprep.subr.bf16.mxu1 %v928_v33 }
  0x15   : > { %v243_v30 = vld [vmem:[%s1032_s20 + $0x78] sm:$0xff] }
  0x16   : > { %848 = vmatmul.mubr.msk.f32.gmra.mrb[2].mxu0 %vm255_vm0, %v231_v18  ;;  %939 = vmatpush3.bf16.msra.mxu1 %v928_v33 }
  0x17   : > { %850 = vmatprep.mubr.msk.f32.mxu0 %vm255_vm0, %v232_v19  ;;  %923 = vmatpush3.bf16.msra.mxu0 %v920_v11  ;;  %v773_v19 = vld [vmem:[%s1140_s4] ss:$0 sm:$0xff] }
  0x18   : > { %925 = vmatprep.subr.bf16.mxu0 %v924_v16 }
  0x1a   : > { %851 = vmatmul.mubr.msk.f32.gmra.mrb[4].mxu0 %vm255_vm0, %v233_v20 }
  0x1b   : > { %853 = vmatprep.mubr.msk.f32.mxu0 %vm255_vm0, %v234_v21  ;;  %927 = vmatpush3.bf16.msra.mxu0 %v924_v16 }
  0x1c   : > { %929 = vmatprep.subr.bf16.mxu0 %v928_v33 }
  0x1e   : > { %854 = vmatmul.mubr.msk.f32.gmra.mrb[6].mxu0 %vm255_vm0, %v235_v22 }
  0x1f   : > { %856 = vmatprep.mubr.msk.f32.mxu0 %vm255_vm0, %v236_v23  ;;  %931 = vmatpush3.bf16.msra.mxu0 %v928_v33 }
  0x22   : > { %857 = vmatmul.mubr.msk.f32.gmra.mrb[8].mxu0 %vm255_vm0, %v237_v24 }
  0x23   : > { %859 = vmatprep.mubr.msk.f32.mxu0 %vm255_vm0, %v238_v25 }
  0x26   : > { %860 = vmatmul.mubr.msk.f32.gmra.mrb[10].mxu0 %vm255_vm0, %v239_v26 }
  0x27   : > { %862 = vmatprep.mubr.msk.f32.mxu0 %vm255_vm0, %v240_v27 }
  0x2a   : > { %863 = vmatmul.mubr.msk.f32.gmra.mrb[12].mxu0 %vm255_vm0, %v241_v28 }
  0x2b   : > { %865 = vmatprep.mubr.msk.f32.mxu0 %vm255_vm0, %v242_v29 }
  0x2e   : > { %866 = vmatmul.mubr.msk.f32.gmra.mrb[14].mxu0 %vm255_vm0, %v243_v30 }
  0xe5   : > { %v846_v35 = vpop.f32.mrb[0].mxu0 }
  0xe6   : > { %v376_v36 = vadd.f32 %v846_v35, %v756_v34  ;;  %v370_v37 = vpop.f32.mrb[1].mxu0 }
  0xe7   : > { %v371_v38 = vadd.f32 %v756_v34, %v370_v37 }
  0xe8   : > { %v450_v41 = vmax.f32 %v376_v36, 0.0 }
  0xe9   : > { %v449_v39 = vmax.f32 %v371_v38, 0.0  ;;  %v849_v40 = vpop.f32.mrb[2].mxu0 }
  0xea   : > { %v386_v42 = vadd.f32 %v849_v40, %v756_v34  ;;  %v380_v43 = vpop.f32.mrb[3].mxu0 }
  0xeb   : > { %v381_v44 = vadd.f32 %v756_v34, %v380_v43  ;;  %884 = vmatprep.mubr.msk.f32.mxu0 %vm480_vm1, %v449_v39 }
  0xec   : > { %885 = vmatmul.mubr.msk.f32.vlgmr.msra.gmra.mrb[16].mxu0 %vm480_vm1, %v450_v41  ;;  %v452_v47 = vmax.f32 %v386_v42, 0.0 }
  0xed   : > { %v451_v45 = vmax.f32 %v381_v44, 0.0  ;;  %v852_v46 = vpop.f32.mrb[4].mxu0 }
  0xee   : > { %v396_v48 = vadd.f32 %v852_v46, %v756_v34  ;;  %v390_v49 = vpop.f32.mrb[5].mxu0 }
  0xef   : > { %v391_v50 = vadd.f32 %v756_v34, %v390_v49  ;;  %887 = vmatprep.mubr.msk.f32.mxu1 %vm480_vm1, %v451_v45 }
  0xf0   : > { %888 = vmatmul.mubr.msk.f32.vlgmr.msra.gmra.mrb[0].mxu1 %vm480_vm1, %v452_v47  ;;  %v454_v53 = vmax.f32 %v396_v48, 0.0 }
  0xf1   : > { %v453_v51 = vmax.f32 %v391_v50, 0.0  ;;  %v855_v52 = vpop.f32.mrb[6].mxu0 }
  0xf2   : > { %v406_v54 = vadd.f32 %v855_v52, %v756_v34  ;;  %v400_v55 = vpop.f32.mrb[7].mxu0 }
  0xf3   : > { %v401_v56 = vadd.f32 %v756_v34, %v400_v55  ;;  %890 = vmatprep.mubr.msk.f32.mxu1 %vm480_vm1, %v453_v51 }
  0xf4   : > { %891 = vmatmul.mubr.msk.f32.gmra.mrb[2].mxu1 %vm480_vm1, %v454_v53  ;;  %v456_v59 = vmax.f32 %v406_v54, 0.0 }
  0xf5   : > { %v455_v57 = vmax.f32 %v401_v56, 0.0  ;;  %v858_v58 = vpop.f32.mrb[8].mxu0 }
  0xf6   : > { %v416_v60 = vadd.f32 %v858_v58, %v756_v34  ;;  %v410_v61 = vpop.f32.mrb[9].mxu0 }
  0xf7   : > { %v411_v62 = vadd.f32 %v756_v34, %v410_v61  ;;  %893 = vmatprep.mubr.msk.f32.mxu1 %vm480_vm1, %v455_v57 }
  0xf8   : > { %894 = vmatmul.mubr.msk.f32.gmra.mrb[4].mxu1 %vm480_vm1, %v456_v59  ;;  %v458_v1 = vmax.f32 %v416_v60, 0.0 }
  0xf9   : > { %v457_v63 = vmax.f32 %v411_v62, 0.0  ;;  %v861_v0 = vpop.f32.mrb[10].mxu0 }
  0xfa   : > { %v426_v2 = vadd.f32 %v861_v0, %v756_v34  ;;  %v420_v3 = vpop.f32.mrb[11].mxu0 }
  0xfb   : > { %v421_v4 = vadd.f32 %v756_v34, %v420_v3  ;;  %896 = vmatprep.mubr.msk.f32.mxu1 %vm480_vm1, %v457_v63 }
  0xfc   : > { %897 = vmatmul.mubr.msk.f32.gmra.mrb[6].mxu1 %vm480_vm1, %v458_v1  ;;  %v460_v7 = vmax.f32 %v426_v2, 0.0 }
  0xfd   : > { %v459_v5 = vmax.f32 %v421_v4, 0.0  ;;  %v864_v6 = vpop.f32.mrb[12].mxu0 }
  0xfe   : > { %v436_v8 = vadd.f32 %v864_v6, %v756_v34  ;;  %v430_v9 = vpop.f32.mrb[13].mxu0 }
  0xff   : > { %v431_v10 = vadd.f32 %v756_v34, %v430_v9  ;;  %899 = vmatprep.mubr.msk.f32.mxu1 %vm480_vm1, %v459_v5 }
 0x100   : > { %900 = vmatmul.mubr.msk.f32.gmra.mrb[8].mxu1 %vm480_vm1, %v460_v7  ;;  %v462_v13 = vmax.f32 %v436_v8, 0.0 }
 0x101   : > { %v461_v11 = vmax.f32 %v431_v10, 0.0  ;;  %v867_v12 = vpop.f32.mrb[14].mxu0 }
 0x102   : > { %v446_v14 = vadd.f32 %v867_v12, %v756_v34  ;;  %v440_v15 = vpop.f32.mrb[15].mxu0 }
 0x103   : > { %v441_v16 = vadd.f32 %v756_v34, %v440_v15  ;;  %902 = vmatprep.mubr.msk.f32.mxu1 %vm480_vm1, %v461_v11 }
 0x104   : > { %903 = vmatmul.mubr.msk.f32.gmra.mrb[10].mxu1 %vm480_vm1, %v462_v13  ;;  %v464_v18 = vmax.f32 %v446_v14, 0.0 }
 0x105   : > { %v463_v17 = vmax.f32 %v441_v16, 0.0 }
 0x107   : > { %905 = vmatprep.mubr.msk.f32.mxu1 %vm480_vm1, %v463_v17 }
 0x108   : > { %906 = vmatmul.mubr.msk.f32.gmra.mrb[12].mxu1 %vm480_vm1, %v464_v18 }
 0x1bf   : > { %v886_v20 = vpop.f32.mrb[16].mxu0 }
 0x1c0   : > { %v601_v21 = vadd.f32 %v886_v20, %v773_v19  ;;  %v595_v22 = vpop.f32.mrb[17].mxu0 }
 0x1c1   : > { %v596_v23 = vadd.f32 %v773_v19, %v595_v22 }
 0x1c2   : > { %676 = vst.msk [vmem:[%s1099_s7 + $0x8] sm:$0xff] %vm674_vm2, %v601_v21 }
 0x1c3   : > { %675 = vst.msk [vmem:[%s1099_s7] sm:$0xff] %vm674_vm2, %v596_v23  ;;  %v889_v24 = vpop.f32.mrb[0].mxu1 }
 0x1c4   : > { %v611_v25 = vadd.f32 %v889_v24, %v773_v19  ;;  %v605_v26 = vpop.f32.mrb[1].mxu1 }
 0x1c5   : > { %v606_v27 = vadd.f32 %v773_v19, %v605_v26 }
 0x1c6   : > { %678 = vst.msk [vmem:[%s1099_s7 + $0x18] sm:$0xff] %vm674_vm2, %v611_v25 }
 0x1c7   : > { %677 = vst.msk [vmem:[%s1099_s7 + $0x10] sm:$0xff] %vm674_vm2, %v606_v27  ;;  %v892_v28 = vpop.f32.mrb[2].mxu1 }
 0x1c8   : > { %v621_v29 = vadd.f32 %v892_v28, %v773_v19  ;;  %v615_v30 = vpop.f32.mrb[3].mxu1 }
 0x1c9   : > { %v616_v31 = vadd.f32 %v773_v19, %v615_v30 }
 0x1ca   : > { %680 = vst.msk [vmem:[%s1099_s7 + $0x28] sm:$0xff] %vm674_vm2, %v621_v29 }
 0x1cb   : > { %679 = vst.msk [vmem:[%s1099_s7 + $0x20] sm:$0xff] %vm674_vm2, %v616_v31  ;;  %v895_v32 = vpop.f32.mrb[4].mxu1 }
 0x1cc   : > { %v631_v33 = vadd.f32 %v895_v32, %v773_v19  ;;  %v625_v34 = vpop.f32.mrb[5].mxu1 }
 0x1cd   : > { %v626_v35 = vadd.f32 %v773_v19, %v625_v34 }
 0x1ce   : > { %682 = vst.msk [vmem:[%s1099_s7 + $0x38] sm:$0xff] %vm674_vm2, %v631_v33 }
 0x1cf   : > { %681 = vst.msk [vmem:[%s1099_s7 + $0x30] sm:$0xff] %vm674_vm2, %v626_v35  ;;  %v898_v36 = vpop.f32.mrb[6].mxu1 }
 0x1d0   : > { %v641_v37 = vadd.f32 %v898_v36, %v773_v19  ;;  %v635_v38 = vpop.f32.mrb[7].mxu1 }
 0x1d1   : > { %v636_v39 = vadd.f32 %v773_v19, %v635_v38 }
 0x1d2   : > { %684 = vst.msk [vmem:[%s1099_s7 + $0x48] sm:$0xff] %vm674_vm2, %v641_v37 }
 0x1d3   : > { %683 = vst.msk [vmem:[%s1099_s7 + $0x40] sm:$0xff] %vm674_vm2, %v636_v39  ;;  %v901_v40 = vpop.f32.mrb[8].mxu1 }
 0x1d4   : > { %v651_v41 = vadd.f32 %v901_v40, %v773_v19  ;;  %v645_v42 = vpop.f32.mrb[9].mxu1 }
 0x1d5   : > { %v646_v43 = vadd.f32 %v773_v19, %v645_v42 }
 0x1d6   : > { %686 = vst.msk [vmem:[%s1099_s7 + $0x58] sm:$0xff] %vm674_vm2, %v651_v41 }
 0x1d7   : > { %685 = vst.msk [vmem:[%s1099_s7 + $0x50] sm:$0xff] %vm674_vm2, %v646_v43  ;;  %v904_v44 = vpop.f32.mrb[10].mxu1 }
 0x1d8   : > { %v661_v45 = vadd.f32 %v904_v44, %v773_v19  ;;  %v655_v46 = vpop.f32.mrb[11].mxu1 }
 0x1d9   : > { %v656_v47 = vadd.f32 %v773_v19, %v655_v46 }
 0x1da   : > { %688 = vst.msk [vmem:[%s1099_s7 + $0x68] sm:$0xff] %vm674_vm2, %v661_v45 }
 0x1db   : > { %687 = vst.msk [vmem:[%s1099_s7 + $0x60] sm:$0xff] %vm674_vm2, %v656_v47  ;;  %v907_v48 = vpop.f32.mrb[12].mxu1 }
 0x1dc   : > { %v671_v49 = vadd.f32 %v907_v48, %v773_v19  ;;  %v665_v50 = vpop.f32.mrb[13].mxu1 }
 0x1dd   : > { %v666_v51 = vadd.f32 %v773_v19, %v665_v50 }
 0x1de   : > { %690 = vst.msk [vmem:[%s1099_s7 + $0x78] sm:$0xff] %vm674_vm2, %v671_v49 }
 0x1df   : > { %689 = vst.msk [vmem:[%s1099_s7 + $0x70] sm:$0xff] %vm674_vm2, %v666_v51 }
 0x1e0 PF: > { %s15_s18 = sadd.s32 1, %s954_s18  }
 0x1e1   : > { %p12_p4 = scmp.ge.s32.totalorder %s15_s18, 4  }
 0x1e3   :  { %14 = sbr.rel (!%p12_p4) target bundleno = 1 (0x1), region = 70 }

</bundles_post_ra>
